<compile_context>
chip_gen: v5e
topology: v5e:2x2
jax: 0.10.0
libtpu: 0.0.40
codegen_flags: <defaults>
</compile_context>

<pallas_src>
import jax
import jax.numpy as jnp
from jax import lax
from jax.experimental import pallas as pl
from jax.experimental.pallas import tpu as pltpu


# ---------------------------------------------------------------------------
# Kernels
# ---------------------------------------------------------------------------

def _l2norm_kernel_small_c(x_ref, w_ref, o_ref):
    """Small-C layout. x_ref: (BN, C, TILE_S, 128); w_ref: (1, C, 1, 1).

    Spatial positions live on (sublane, lane); the channel reduction is over a
    leading axis, i.e. plain vreg-wise VPU adds — no sublane padding anywhere.
    """
    x = x_ref[...].astype(jnp.float32)
    sumsq = jnp.sum(x * x, axis=1, keepdims=True)      # (BN, 1, TILE_S, 128)
    inv_norm = lax.rsqrt(sumsq)                        # EUP slot
    w = w_ref[...].astype(jnp.float32)                 # (1, C, 1, 1)
    o_ref[...] = (w * x * inv_norm).astype(o_ref.dtype)


def _l2norm_kernel_general(x_ref, w_ref, o_ref):
    """General layout. x_ref: (1, C, TILE_HW); w_ref: (1, C, 1).

    Channels on sublanes (C >= 8/16, fully packed), spatial on lanes; the
    channel reduction is a cheap sublane reduce.
    """
    x = x_ref[...].astype(jnp.float32)
    sumsq = jnp.sum(x * x, axis=1, keepdims=True)      # (1, 1, TILE_HW)
    inv_norm = lax.rsqrt(sumsq)
    w = w_ref[...].astype(jnp.float32)                 # (1, C, 1)
    o_ref[...] = (w * x * inv_norm).astype(o_ref.dtype)


# ---------------------------------------------------------------------------
# Sizing helpers
# ---------------------------------------------------------------------------

def _vmem_budgets():
    """Return (per-block byte budget, vmem_limit_bytes), generation-aware.

    Pipeline footprint ~= 4x block bytes (in x2 buffers + out x2 buffers) plus
    the tiny resident weight, so the limit leaves >=2x headroom over that.
    """
    vmem_cap = None
    try:
        vmem_cap = pltpu.get_tpu_info().vmem_capacity_bytes
    except Exception:
        vmem_cap = None                      # unknown generation -> conservative
    if vmem_cap is not None and vmem_cap >= 96 * 1024 * 1024:
        # v5e / v6e: 128 MiB physical VMEM -> ~8 MiB blocks, ~32 MiB footprint.
        return 8 * 1024 * 1024, 64 * 1024 * 1024
    # v7x (64 MiB per TensorCore) or unknown: cap blocks at 4 MiB.
    return 4 * 1024 * 1024, 32 * 1024 * 1024


# ---------------------------------------------------------------------------
# Wrappers
# ---------------------------------------------------------------------------

def _l2norm_small_c(x_nchw, weight, block_budget, vmem_limit, cost):
    N, C, H, W = x_nchw.shape
    HW = H * W
    elem_bytes = jnp.dtype(x_nchw.dtype).itemsize
    S = HW // 128                                       # HW % 128 == 0 guaranteed

    # Fold spatial onto (sublane, lane) so C < 8/16 causes no sublane padding.
    # TODO(synk): confirm in xprof that this view lowers to a bitcast, not an
    # HBM relayout copy; if it materializes, feed the 4-D array directly.
    x4 = x_nchw.reshape(N, C, S, 128)
    w4 = weight.reshape(1, C, 1, 1)

    total_bytes = N * C * HW * elem_bytes
    tiny = total_bytes <= min(block_budget, 1 << 20)

    if tiny:
        # Tiny-problem fast path: one block, one grid step.
        block_n, tile_s = N, S
        grid = (1, 1)
    else:
        block_n = 1
        row_bytes = C * 128 * elem_bytes
        if S * row_bytes <= block_budget:
            tile_s = S
        else:
            tile_s = max(8, (block_budget // row_bytes) // 8 * 8)
        # v7x has 2 TensorCores: keep >= 2 parallel programs when possible.
        if N == 1 and tile_s >= S and S >= 16:
            tile_s = max(8, pl.cdiv(S, 2) // 8 * 8)
        grid = (N, pl.cdiv(S, tile_s))

    block_bytes = block_n * C * tile_s * 128 * elem_bytes
    x_spec_kwargs = {}
    if grid[0] * grid[1] > 1 and block_bytes <= (1 << 20):
        # Pure streaming: a 3rd input buffer keeps the DMA queue full when the
        # blocks are forced small.
        x_spec_kwargs["pipeline_mode"] = pl.Buffered(3)

    x_spec = pl.BlockSpec((block_n, C, tile_s, 128),
                          lambda n, j: (n, 0, j, 0), **x_spec_kwargs)
    w_spec = pl.BlockSpec((1, C, 1, 1), lambda n, j: (0, 0, 0, 0))   # resident
    o_spec = pl.BlockSpec((block_n, C, tile_s, 128), lambda n, j: (n, 0, j, 0))

    out4 = pl.pallas_call(
        _l2norm_kernel_small_c,
        out_shape=jax.ShapeDtypeStruct((N, C, S, 128), x4.dtype),
        grid_spec=pltpu.PrefetchScalarGridSpec(
            num_scalar_prefetch=0,
            grid=grid,
            in_specs=[x_spec, w_spec],
            out_specs=o_spec,
        ),
        compiler_params=pltpu.CompilerParams(
            dimension_semantics=("parallel", "parallel"),
            vmem_limit_bytes=vmem_limit,
        ),
        cost_estimate=cost,
    )(x4, w4)

    return out4.reshape(N, C, H, W)


def _l2norm_general(x_nchw, weight, block_budget, vmem_limit, cost):
    N, C, H, W = x_nchw.shape
    HW = H * W
    elem_bytes = jnp.dtype(x_nchw.dtype).itemsize

    # TODO(synk): confirm in xprof that this (N,C,H,W)->(N,C,HW) view is a
    # bitcast, not a relayout; if it materializes, switch to a 4-D BlockSpec.
    x3 = x_nchw.reshape(N, C, HW)
    w3 = weight.reshape(1, C, 1)

    row_bytes = C * elem_bytes
    if HW * row_bytes <= block_budget:
        tile_hw = HW                                   # full extent is legal
    else:
        tile_hw = max(128, (block_budget // row_bytes) // 128 * 128)

    # v7x has 2 TensorCores: keep >= 2 parallel programs when possible.
    if N == 1 and tile_hw >= HW and HW >= 256:
        tile_hw = max(128, pl.cdiv(HW, 2) // 128 * 128)

    grid = (N, pl.cdiv(HW, tile_hw))

    block_bytes = C * tile_hw * elem_bytes
    x_spec_kwargs = {}
    if grid[0] * grid[1] > 1 and block_bytes <= (1 << 20):
        x_spec_kwargs["pipeline_mode"] = pl.Buffered(3)

    out3 = pl.pallas_call(
        _l2norm_kernel_general,
        out_shape=jax.ShapeDtypeStruct((N, C, HW), x3.dtype),
        grid_spec=pltpu.PrefetchScalarGridSpec(
            num_scalar_prefetch=0,
            grid=grid,
            in_specs=[
                pl.BlockSpec((1, C, tile_hw), lambda n, j: (n, 0, j),
                             **x_spec_kwargs),
                pl.BlockSpec((1, C, 1), lambda n, j: (0, 0, 0)),     # resident
            ],
            out_specs=pl.BlockSpec((1, C, tile_hw), lambda n, j: (n, 0, j)),
        ),
        compiler_params=pltpu.CompilerParams(
            dimension_semantics=("parallel", "parallel"),
            vmem_limit_bytes=vmem_limit,
        ),
        cost_estimate=cost,
    )(x3, w3)

    return out3.reshape(N, C, H, W)


def l2norm(x_nchw, weight):
    """x_nchw: (N, C, H, W); weight: (C,). Returns (N, C, H, W)."""
    N, C, H, W = x_nchw.shape
    HW = H * W
    elem_bytes = jnp.dtype(x_nchw.dtype).itemsize
    sublanes = max(1, (8 * 4) // elem_bytes)           # 8 f32, 16 bf16, 32 int8

    block_budget, vmem_limit = _vmem_budgets()

    # Advisory roofline hint for XLA's scheduler: one read + one write of x,
    # one rsqrt per spatial position.
    cost = pl.CostEstimate(
        flops=3 * N * C * HW,
        transcendentals=N * HW,
        bytes_accessed=2 * N * C * HW * elem_bytes + C * elem_bytes,
    )

    if C < sublanes and HW % 128 == 0:
        return _l2norm_small_c(x_nchw, weight, block_budget, vmem_limit, cost)
    return _l2norm_general(x_nchw, weight, block_budget, vmem_limit, cost)


if __name__ == "__main__":
    # module config: n_channels=4, scale(gamma)=20.0
    N, C, H, W = 2, 4, 16, 16
    gamma = 20.0

    key = jax.random.PRNGKey(0)
    x = jax.random.normal(key, (N, C, H, W), dtype=jnp.float32)
    weight = jnp.full((C,), gamma, dtype=jnp.float32)  # constant_ init

    out = l2norm(x, weight)
    out = jax.block_until_ready(out)

    # reference check in plain JAX (same math as the PyTorch forward)
    norm = jnp.sqrt(jnp.sum(x * x, axis=1, keepdims=True))
    ref = weight[None, :, None, None] * (x / norm)
    assert out.shape == (N, C, H, W)
    assert jnp.allclose(out, ref, atol=1e-5, rtol=1e-5)

    print("KERNEL_OK")
</pallas_src>

<mosaic_0001>
module attributes {stable_mosaic.version = 11 : i64} {
  func.func @_l2norm_kernel_small_c(%arg0: i32, %arg1: i32, %arg2: memref<2x4x2x128xf32, #tpu.memory_space<vmem>>, %arg3: memref<1x4x1x1xf32, #tpu.memory_space<vmem>>, %arg4: memref<2x4x2x128xf32, #tpu.memory_space<vmem>>) attributes {dimension_semantics = [#tpu.dimension_semantics<parallel>, #tpu.dimension_semantics<parallel>], iteration_bounds = array<i64: 1, 1>, scalar_prefetch = 0 : i64, scratch_operands = 0 : i64, tpu.core_type = #tpu.core_type<tc>, window_params = [{transform_indices = @transform_0, window_bounds = array<i64: 2, 4, 2, 128>}, {pipeline_mode = #tpu.pipeline_mode<synchronous>, transform_indices = @transform_1, window_bounds = array<i64: 1, 4, 1, 1>}, {transform_indices = @transform_2, window_bounds = array<i64: 2, 4, 2, 128>}]} {
    %c0 = arith.constant 0 : index
    %c0_0 = arith.constant 0 : index
    %c0_1 = arith.constant 0 : index
    %c0_2 = arith.constant 0 : index
    %0 = vector.load %arg2[%c0, %c0_0, %c0_1, %c0_2] : memref<2x4x2x128xf32, #tpu.memory_space<vmem>>, vector<2x4x2x128xf32>
    %1 = arith.mulf %0, %0 : vector<2x4x2x128xf32>
    %cst = arith.constant dense<0.000000e+00> : vector<2x2x128xf32>
    %2 = vector.multi_reduction <add>, %1, %cst [1] : vector<2x4x2x128xf32> to vector<2x2x128xf32>
    %3 = vector.shape_cast %2 : vector<2x2x128xf32> to vector<2x1x2x128xf32>
    %4 = math.rsqrt %3 : vector<2x1x2x128xf32>
    %c0_3 = arith.constant 0 : index
    %c0_4 = arith.constant 0 : index
    %c0_5 = arith.constant 0 : index
    %c0_6 = arith.constant 0 : index
    %5 = vector.load %arg3[%c0_3, %c0_4, %c0_5, %c0_6] : memref<1x4x1x1xf32, #tpu.memory_space<vmem>>, vector<1x4x1x1xf32>
    %6 = vector.broadcast %5 : vector<1x4x1x1xf32> to vector<2x4x2x128xf32>
    %7 = arith.mulf %6, %0 : vector<2x4x2x128xf32>
    %8 = vector.broadcast %4 : vector<2x1x2x128xf32> to vector<2x4x2x128xf32>
    %9 = arith.mulf %7, %8 : vector<2x4x2x128xf32>
    %c0_7 = arith.constant 0 : index
    %c0_8 = arith.constant 0 : index
    %c0_9 = arith.constant 0 : index
    %c0_10 = arith.constant 0 : index
    %10 = vector.load %arg4[%c0_7, %c0_8, %c0_9, %c0_10] : memref<2x4x2x128xf32, #tpu.memory_space<vmem>>, vector<2x4x2x128xf32>
    tpu.vector_store %arg4[%c0_7, %c0_8, %c0_9, %c0_10], %9 {strides = array<i32>} : memref<2x4x2x128xf32, #tpu.memory_space<vmem>>, vector<2x4x2x128xf32>,
    return
  }
  func.func @transform_0(%arg0: i32, %arg1: i32) -> (i32, i32, i32, i32) {
    %c0_i32 = arith.constant 0 : i32
    %c0_i32_0 = arith.constant 0 : i32
    %c0_i32_1 = arith.constant 0 : i32
    return %arg0, %c0_i32, %arg1, %c0_i32_0 : i32, i32, i32, i32
  }
  func.func @transform_1(%arg0: i32, %arg1: i32) -> (i32, i32, i32, i32) {
    %c0_i32 = arith.constant 0 : i32
    %c0_i32_0 = arith.constant 0 : i32
    %c0_i32_1 = arith.constant 0 : i32
    %c0_i32_2 = arith.constant 0 : i32
    %c0_i32_3 = arith.constant 0 : i32
    return %c0_i32, %c0_i32_0, %c0_i32_1, %c0_i32_2 : i32, i32, i32, i32
  }
  func.func @transform_2(%arg0: i32, %arg1: i32) -> (i32, i32, i32, i32) {
    %c0_i32 = arith.constant 0 : i32
    %c0_i32_0 = arith.constant 0 : i32
    %c0_i32_1 = arith.constant 0 : i32
    return %arg0, %c0_i32, %arg1, %c0_i32_0 : i32, i32, i32, i32
  }
}

</mosaic_0001>

<bundles_post_ra>
// kernel: tpu_custom_call.1
= control target key start
LH: loop header
LB: loop body
LE: loop exit
PB: predicated region body
PF: predicated region fallthrough
CT: control target
= control target key end

     0   :  { %7 = vsyncpa [#allocation3], 0  ;;  %s279_s0 = inlined_call_operand.hbm [shape: f32[2,4,2,128], index: 0, kind: input, shape index: {}]   ;;  %s280_s1 = inlined_call_operand.vmem [shape: f32[1,4,1,1], index: 1, kind: input, shape index: {}]   ;;  %s281_s2 = inlined_call_operand.hbm [shape: f32[2,4,2,128], index: 2, kind: output, shape index: {}]  }
   0x1   :  { %8 = vsyncpa [#allocation4], 0  ;;  %s13_s11 = sshll.u32 %s279_s0, 4  ;;  %s217_s12 = smov [#allocation2]   ;;  %s14_s11 = int_to_ptr.hbm [resolvable:$true] %s13_s11 }
   0x2   :  { %s15_s13 = sshll.u32 %s217_s12, 4  ;;  %s218_s14 = smov 32   ;;  %s16_s13 = int_to_ptr.vmem [resolvable:$true] %s15_s13 }
   0x3   :  { %s219_s15 = smov 2  }
   0x4   :  { %21 = dma.hbm_to_vmem [thread:$0]  %s14_s11, 256, %s16_s13, [#allocation3], %s218_s14, %s218_s14, %s219_s15  }
   0x5   :  { %213 = dma.done.wait [#allocation3], 256  }
   0x6   :  { %214 = vsyncadd [#allocation3], 4294967040  ;;  %v220_v0 = vmov 0   ;;  %v157_v1 = vld [vmem:[%s280_s1 + $0x2] ss:$0 sm:$0xff]  ;;  %vm44_vm0 = vcmask 1041408  }
   0x7   :  { %156 = vset.pattern.permute.xlu1 %v220_v0  ;;  %155 = vset.pattern.permute.xlu0 %v220_v0  ;;  %v158_v2 = vld [vmem:[%s280_s1] ss:$0 sm:$0xff]  ;;  %v159_v3 = vld [vmem:[%s280_s1 + $0x3] ss:$0 sm:$0xff]  ;;  %v160_v4 = vld [vmem:[%s280_s1 + $0x1] ss:$0 sm:$0xff] }
   0x8   :  { %100 = vperm.xlu1 %156, %v157_v1   ;;  %92 = vperm.xlu0 %155, %v158_v2   ;;  %v28_v5 = vld [vmem:[#allocation2] sm:$0x3]  ;;  %v255_v6 = vld [vmem:[#allocation2 + $0x2] sm:$0x3]  ;;  %v32_v7 = vld [vmem:[#allocation2 + $0x8] sm:$0x3] }
   0x9   :  { %v257_v8 = vld [vmem:[#allocation2 + $0xa] sm:$0x3]  ;;  %v36_v9 = vmul.f32 %v28_v5, %v28_v5  ;;  %v37_v10 = vmul.f32 %v255_v6, %v255_v6  ;;  %v30_v11 = vld [vmem:[#allocation2 + $0x4] sm:$0x3]  ;;  %v40_v12 = vmul.f32 %v32_v7, %v32_v7  ;;  %v34_v14 = vld [vmem:[#allocation2 + $0xc] sm:$0x3] }
   0xa   :  { %v41_v13 = vmul.f32 %v257_v8, %v257_v8  ;;  %v38_v15 = vmul.f32 %v30_v11, %v30_v11  ;;  %v42_v18 = vmul.f32 %v34_v14, %v34_v14  ;;  %v31_v20 = vld [vmem:[#allocation2 + $0x6] sm:$0x3]  ;;  %v35_v22 = vld [vmem:[#allocation2 + $0xe] sm:$0x3]  ;;  %s221_s1 = smov [#allocation5]   ;;  %s137_s26 = sshll.u32 %s281_s2, 4  ;;  %s138_s26 = int_to_ptr.hbm [resolvable:$true] %s137_s26 }
   0xb   :  { %v45_v16 = vsel %vm44_vm0, %v36_v9, 0.0  ;;  %v46_v17 = vsel %vm44_vm0, %v37_v10, 0.0  ;;  %v52_v19 = vsel %vm44_vm0, %v40_v12, 0.0  ;;  %v39_v25 = vmul.f32 %v31_v20, %v31_v20  ;;  %s135_s23 = sshll.u32 %s221_s1, 4  ;;  %s136_s23 = int_to_ptr.vmem [resolvable:$true] %s135_s23 }
   0xc   :  { %v53_v21 = vsel %vm44_vm0, %v41_v13, 0.0  ;;  %v47_v23 = vadd.f32 %v46_v17, %v45_v16  ;;  %v48_v24 = vsel %vm44_vm0, %v38_v15, 0.0  ;;  %v55_v27 = vsel %vm44_vm0, %v42_v18, 0.0 }
   0xd   :  { %v54_v26 = vadd.f32 %v53_v21, %v52_v19  ;;  %v43_v28 = vmul.f32 %v35_v22, %v35_v22  ;;  %v50_v30 = vsel %vm44_vm0, %v39_v25, 0.0 }
   0xe   :  { %v49_v29 = vadd.f32 %v48_v24, %v47_v23 }
   0xf   :  { %v56_v31 = vadd.f32 %v55_v27, %v54_v26  ;;  %v57_v32 = vsel %vm44_vm0, %v43_v28, 0.0 }
  0x10   :  { %104 = vperm.xlu1 %156, %v159_v3   ;;  %96 = vperm.xlu0 %155, %v160_v4   ;;  %v51_v33 = vadd.f32 %v50_v30, %v49_v29 }
  0x11   :  { %v58_v34 = vadd.f32 %v57_v32, %v56_v31 }
  0x12   :  { %161 = vrsqrt.f32 %v51_v33  ;;  %vm65_vm1 = vweird.f32 %v51_v33 }
  0x13   :  { %163 = vrsqrt.f32 %v58_v34  ;;  %vm75_vm3 = vweird.f32 %v58_v34 }
  0x18   :  { %v162_v35 = vpop.eup %161 }
  0x19   :  { %v164_v36 = vpop.eup %163  ;;  %v60_v37 = vmul.f32 %v162_v35, %v51_v33  ;;  %vm66_vm2 = vweird.f32 %v162_v35 }
  0x1a   :  { %v70_v38 = vmul.f32 %v164_v36, %v58_v34  ;;  %vm76_vm4 = vweird.f32 %v164_v36  ;;  %vm67_vm5 = vmor %vm65_vm1, %vm66_vm2 }
  0x1b   :  { %v61_v39 = vmul.f32 %v162_v35, %v60_v37  ;;  %vm77_vm6 = vmor %vm75_vm3, %vm76_vm4 }
  0x1c   :  { %v71_v40 = vmul.f32 %v164_v36, %v70_v38 }
  0x1d   :  { %v62_v41 = vmul.f32 0.5, %v61_v39 }
  0x1e   :  { %v72_v42 = vmul.f32 0.5, %v71_v40 }
  0x1f   :  { %v63_v43 = vsub.f32 1.5, %v62_v41 }
  0x20   :  { %v73_v44 = vsub.f32 1.5, %v72_v42 }
  0x21   :  { %v64_v45 = vmul.f32 %v162_v35, %v63_v43 }
  0x22   :  { %v74_v46 = vmul.f32 %v164_v36, %v73_v44 }
  0x23   :  { %v68_v48 = vsel %vm67_vm5, %v162_v35, %v64_v45 }
  0x24   :  { %v78_v52 = vsel %vm77_vm6, %v164_v36, %v74_v46 }
  0x7a   :  { %v101_v47 = vpop.permute.xlu1 %100  ;;  %v93_v51 = vpop.permute.xlu0 %92 }
  0x7b   :  { %v109_v49 = vmul.f32 %v101_v47, %v30_v11  ;;  %v113_v50 = vmul.f32 %v101_v47, %v34_v14  ;;  %v107_v53 = vmul.f32 %v93_v51, %v28_v5  ;;  %v111_v54 = vmul.f32 %v93_v51, %v32_v7 }
  0x7d   :  { %v117_v55 = vmul.f32 %v109_v49, %v68_v48  ;;  %v115_v56 = vmul.f32 %v107_v53, %v68_v48  ;;  %v119_v57 = vmul.f32 %v111_v54, %v78_v52  ;;  %v121_v58 = vmul.f32 %v113_v50, %v78_v52 }
  0x7f   :  { %125 = vst [vmem:[#allocation5 + $0x4] sm:$0x3] %v117_v55 }
  0x80   :  { %123 = vst [vmem:[#allocation5] sm:$0x3] %v115_v56 }
  0x81   :  { %127 = vst [vmem:[#allocation5 + $0x8] sm:$0x3] %v119_v57 }
  0x82   :  { %v105_v59 = vpop.permute.xlu1 %104  ;;  %129 = vst [vmem:[#allocation5 + $0xc] sm:$0x3] %v121_v58  ;;  %v97_v62 = vpop.permute.xlu0 %96 }
  0x83   :  { %v110_v60 = vmul.f32 %v105_v59, %v31_v20  ;;  %v114_v61 = vmul.f32 %v105_v59, %v35_v22  ;;  %v108_v63 = vmul.f32 %v97_v62, %v255_v6  ;;  %v112_v0 = vmul.f32 %v97_v62, %v257_v8 }
  0x85   :  { %v118_v1 = vmul.f32 %v110_v60, %v68_v48  ;;  %v116_v2 = vmul.f32 %v108_v63, %v68_v48  ;;  %v120_v3 = vmul.f32 %v112_v0, %v78_v52  ;;  %v122_v4 = vmul.f32 %v114_v61, %v78_v52 }
  0x87   :  { %126 = vst [vmem:[#allocation5 + $0x6] sm:$0x3] %v118_v1 }
  0x88   :  { %124 = vst [vmem:[#allocation5 + $0x2] sm:$0x3] %v116_v2 }
  0x89   :  { %128 = vst [vmem:[#allocation5 + $0xa] sm:$0x3] %v120_v3 }
  0x8a   :  { %130 = vst [vmem:[#allocation5 + $0xe] sm:$0x3] %v122_v4 }
  0x8b   :  { %143 = dma.vmem_to_hbm [thread:$0]  %s136_s23, 256, %s138_s26, [#allocation4], %s218_s14, %s218_s14, %s219_s15  }
  0x8c   :  { %215 = dma.done.wait [#allocation4], 256  }
  0x8d   :  { %216 = vsyncadd [#allocation4], 4294967040 }
  0x8e   :  { %148 = vsyncpa [#allocation3], 1 }
  0x8f   :  { %149 = vsyncpa [#allocation4], 1 }

</bundles_post_ra>
